<compile_context>
chip_gen: v7x
topology: tpu7x:2x2x1
jax: 0.10.0
libtpu: 0.0.40
codegen_flags: <defaults>
</compile_context>

<pallas_src>
import functools

import jax
import jax.numpy as jnp
from jax.experimental import pallas as pl
from jax.experimental.pallas import tpu as pltpu

O_LOGICAL = 3   # real output width of the module
O_PAD = 8       # padded output width (full-array last dim, so block is legal)


def _leaky_relu(x, slope=0.3):
    # max(x, slope*x) == LeakyReLU(slope) for slope in (0, 1); 2 VALU ops.
    return jnp.maximum(x, slope * x)


def mlp_kernel(x_ref, w1_ref, b1_ref, w2_ref, b2_ref, o_ref):
    # x_ref:  (tile_b, F)   activations tile (last block may be ragged)
    # w1_ref: (F, H), b1_ref: (1, H)        -- resident across grid steps
    # w2_ref: (H, O_PAD), b2_ref: (1, O_PAD) -- zero-padded from 3 -> 8
    # o_ref:  (tile_b, O_PAD)
    h = jnp.dot(x_ref[...], w1_ref[...], preferred_element_type=jnp.float32)
    h = _leaky_relu(h + b1_ref[...])
    o = jnp.dot(h, w2_ref[...], preferred_element_type=jnp.float32)
    o_ref[...] = _leaky_relu(o + b2_ref[...])


def _round_up(v, m):
    return ((v + m - 1) // m) * m


def pad_output_params(w2, b2):
    """Zero-pad layer-2 params from 3 -> O_PAD columns.  Call ONCE per model."""
    H, O = w2.shape
    w2p = jnp.zeros((H, O_PAD), jnp.float32).at[:, :O].set(w2)
    b2p = jnp.zeros((1, O_PAD), jnp.float32).at[:, :O].set(b2.reshape(1, -1))
    return w2p, b2p


@functools.partial(jax.jit, static_argnames=("block_rows",))
def nn_model_forward(x, w1, b1, w2p, b2p, *, block_rows=1024):
    """Forward pass of NNModel.

    x: (B, F) f32; w1: (F, H); b1: (1, H); w2p/b2p: padded layer-2 params
    from pad_output_params().  Returns (B, 3) f32.
    """
    B, F = x.shape
    H = w1.shape[1]

    # Batch tile:
    #   * multiple of 8 sublanes (block-shape legality),
    #   * small enough that the grid has >= 2 steps for medium/large B
    #     (v7x dual-TensorCore sharding via "parallel"),
    #   * capped at 2048 so the (tile_b, H) f32 hidden activation stays far
    #     below the v7x 64 MiB VMEM ceiling.
    tile_b = min(
        _round_up(block_rows, 8),
        max(8, _round_up(pl.cdiv(B, 2), 8)),
        2048,
    )
    grid = (pl.cdiv(B, tile_b),)   # ragged last block handled by Pallas

    out = pl.pallas_call(
        mlp_kernel,
        out_shape=jax.ShapeDtypeStruct((B, O_PAD), jnp.float32),
        grid=grid,
        in_specs=[
            pl.BlockSpec((tile_b, F), lambda i: (i, 0)),    # x: tiled over batch
            pl.BlockSpec((F, H), lambda i: (0, 0)),         # w1: resident
            pl.BlockSpec((1, H), lambda i: (0, 0)),         # b1: resident
            pl.BlockSpec((H, O_PAD), lambda i: (0, 0)),     # w2 (padded): resident
            pl.BlockSpec((1, O_PAD), lambda i: (0, 0)),     # b2 (padded): resident
        ],
        out_specs=pl.BlockSpec((tile_b, O_PAD), lambda i: (i, 0)),
        compiler_params=pltpu.CompilerParams(
            dimension_semantics=("parallel",),
        ),
    )(x, w1, b1, w2p, b2p)

    return out[:, :O_LOGICAL]


def init_params(key, in_features, hid1, out_features=3):
    # Mimic PyTorch's default U(-1/sqrt(fan_in), 1/sqrt(fan_in)) init.
    k1, k2, k3, k4 = jax.random.split(key, 4)
    bound1 = 1.0 / jnp.sqrt(in_features)
    bound2 = 1.0 / jnp.sqrt(hid1)
    w1 = jax.random.uniform(k1, (in_features, hid1), jnp.float32, -bound1, bound1)
    b1 = jax.random.uniform(k2, (1, hid1), jnp.float32, -bound1, bound1)
    w2 = jax.random.uniform(k3, (hid1, out_features), jnp.float32, -bound2, bound2)
    b2 = jax.random.uniform(k4, (1, out_features), jnp.float32, -bound2, bound2)
    return w1, b1, w2, b2


def _reference(x, w1, b1, w2, b2):
    def lrelu(v):
        return jnp.maximum(v, 0) + 0.3 * jnp.minimum(v, 0)
    return lrelu(lrelu(x @ w1 + b1) @ w2 + b2)


if __name__ == "__main__":
    key = jax.random.PRNGKey(0)
    kx, kp = jax.random.split(key)

    # Small shapes consistent with the module: the cirrhosis dataframe after
    # one-hot dummies has ~24 feature columns; hid1=1024 is the module default.
    batch = 8
    in_features = 24
    hid1 = 1024

    # TODO(synk): pandas get_dummies / one-hot preprocessing is data prep,
    # not part of the nn.Module forward, so it is not translated to Pallas.

    x = jax.random.normal(kx, (batch, in_features), jnp.float32)
    w1, b1, w2, b2 = init_params(kp, in_features, hid1)
    w2p, b2p = pad_output_params(w2, b2)   # padded once, reused for all calls

    out = nn_model_forward(x, w1, b1, w2p, b2p)
    out = jax.block_until_ready(out)

    ref = _reference(x, w1, b1, w2, b2)
    assert out.shape == (batch, 3)
    assert jnp.allclose(out, ref, atol=1e-4, rtol=1e-4)

    # Multi-tile grid + ragged last block (B=300 not a multiple of tile_b).
    x2 = jax.random.normal(jax.random.PRNGKey(1), (300, in_features), jnp.float32)
    out2 = jax.block_until_ready(
        nn_model_forward(x2, w1, b1, w2p, b2p, block_rows=128))
    ref2 = _reference(x2, w1, b1, w2, b2)
    assert out2.shape == (300, 3)
    assert jnp.allclose(out2, ref2, atol=1e-4, rtol=1e-4)

    print("KERNEL_OK")
</pallas_src>

<mosaic_0001>
module attributes {stable_mosaic.version = 11 : i64} {
  func.func @mlp_kernel(%arg0: i32, %arg1: memref<8x24xf32, #tpu.memory_space<vmem>>, %arg2: memref<24x1024xf32, #tpu.memory_space<vmem>>, %arg3: memref<1x1024xf32, #tpu.memory_space<vmem>>, %arg4: memref<1024x8xf32, #tpu.memory_space<vmem>>, %arg5: memref<1x8xf32, #tpu.memory_space<vmem>>, %arg6: memref<8x8xf32, #tpu.memory_space<vmem>>) attributes {dimension_semantics = [#tpu.dimension_semantics<parallel>], iteration_bounds = array<i64: 1>, scalar_prefetch = 0 : i64, scratch_operands = 0 : i64, tpu.core_type = #tpu.core_type<tc>, window_params = [{transform_indices = @transform_0, window_bounds = array<i64: 8, 24>}, {pipeline_mode = #tpu.pipeline_mode<synchronous>, transform_indices = @transform_1, window_bounds = array<i64: 24, 1024>}, {pipeline_mode = #tpu.pipeline_mode<synchronous>, transform_indices = @transform_2, window_bounds = array<i64: 1, 1024>}, {pipeline_mode = #tpu.pipeline_mode<synchronous>, transform_indices = @transform_3, window_bounds = array<i64: 1024, 8>}, {pipeline_mode = #tpu.pipeline_mode<synchronous>, transform_indices = @transform_4, window_bounds = array<i64: 1, 8>}, {transform_indices = @transform_5, window_bounds = array<i64: 8, 8>}]} {
    %c0 = arith.constant 0 : index
    %c0_0 = arith.constant 0 : index
    %0 = vector.load %arg1[%c0, %c0_0] : memref<8x24xf32, #tpu.memory_space<vmem>>, vector<8x24xf32>
    %c0_1 = arith.constant 0 : index
    %c0_2 = arith.constant 0 : index
    %1 = vector.load %arg2[%c0_1, %c0_2] : memref<24x1024xf32, #tpu.memory_space<vmem>>, vector<24x1024xf32>
    %cst = arith.constant dense<0.000000e+00> : vector<8x1024xf32>
    %2 = tpu.matmul %0, %1, %cst {dimension_numbers = #tpu.dot_dimension_numbers<[1], [0], [0], [1], [0, 0, 1, 1], [], []>} : vector<8x24xf32>, vector<24x1024xf32>, vector<8x1024xf32> -> vector<8x1024xf32>
    %c0_3 = arith.constant 0 : index
    %c0_4 = arith.constant 0 : index
    %3 = vector.load %arg3[%c0_3, %c0_4] : memref<1x1024xf32, #tpu.memory_space<vmem>>, vector<1x1024xf32>
    %4 = vector.broadcast %3 : vector<1x1024xf32> to vector<8x1024xf32>
    %5 = arith.addf %2, %4 : vector<8x1024xf32>
    %cst_5 = arith.constant 3.000000e-01 : f32
    %6 = vector.broadcast %cst_5 : f32 to vector<8x1024xf32>
    %7 = arith.mulf %6, %5 : vector<8x1024xf32>
    %8 = arith.maximumf %5, %7 : vector<8x1024xf32>
    %c0_6 = arith.constant 0 : index
    %c0_7 = arith.constant 0 : index
    %9 = vector.load %arg4[%c0_6, %c0_7] : memref<1024x8xf32, #tpu.memory_space<vmem>>, vector<1024x8xf32>
    %cst_8 = arith.constant dense<0.000000e+00> : vector<8x8xf32>
    %10 = tpu.matmul %8, %9, %cst_8 {dimension_numbers = #tpu.dot_dimension_numbers<[1], [0], [0], [1], [0, 0, 1, 1], [], []>} : vector<8x1024xf32>, vector<1024x8xf32>, vector<8x8xf32> -> vector<8x8xf32>
    %c0_9 = arith.constant 0 : index
    %c0_10 = arith.constant 0 : index
    %11 = vector.load %arg5[%c0_9, %c0_10] : memref<1x8xf32, #tpu.memory_space<vmem>>, vector<1x8xf32>
    %12 = vector.broadcast %11 : vector<1x8xf32> to vector<8x8xf32>
    %13 = arith.addf %10, %12 : vector<8x8xf32>
    %cst_11 = arith.constant 3.000000e-01 : f32
    %14 = vector.broadcast %cst_11 : f32 to vector<8x8xf32>
    %15 = arith.mulf %14, %13 : vector<8x8xf32>
    %16 = arith.maximumf %13, %15 : vector<8x8xf32>
    %c0_12 = arith.constant 0 : index
    %c0_13 = arith.constant 0 : index
    %17 = vector.load %arg6[%c0_12, %c0_13] : memref<8x8xf32, #tpu.memory_space<vmem>>, vector<8x8xf32>
    tpu.vector_store %arg6[%c0_12, %c0_13], %16 {strides = array<i32>} : memref<8x8xf32, #tpu.memory_space<vmem>>, vector<8x8xf32>,
    return
  }
  func.func @transform_0(%arg0: i32) -> (i32, i32) {
    %c0_i32 = arith.constant 0 : i32
    %c0_i32_0 = arith.constant 0 : i32
    return %arg0, %c0_i32 : i32, i32
  }
  func.func @transform_1(%arg0: i32) -> (i32, i32) {
    %c0_i32 = arith.constant 0 : i32
    %c0_i32_0 = arith.constant 0 : i32
    %c0_i32_1 = arith.constant 0 : i32
    return %c0_i32, %c0_i32_0 : i32, i32
  }
  func.func @transform_2(%arg0: i32) -> (i32, i32) {
    %c0_i32 = arith.constant 0 : i32
    %c0_i32_0 = arith.constant 0 : i32
    %c0_i32_1 = arith.constant 0 : i32
    return %c0_i32, %c0_i32_0 : i32, i32
  }
  func.func @transform_3(%arg0: i32) -> (i32, i32) {
    %c0_i32 = arith.constant 0 : i32
    %c0_i32_0 = arith.constant 0 : i32
    %c0_i32_1 = arith.constant 0 : i32
    return %c0_i32, %c0_i32_0 : i32, i32
  }
  func.func @transform_4(%arg0: i32) -> (i32, i32) {
    %c0_i32 = arith.constant 0 : i32
    %c0_i32_0 = arith.constant 0 : i32
    %c0_i32_1 = arith.constant 0 : i32
    return %c0_i32, %c0_i32_0 : i32, i32
  }
  func.func @transform_5(%arg0: i32) -> (i32, i32) {
    %c0_i32 = arith.constant 0 : i32
    %c0_i32_0 = arith.constant 0 : i32
    return %arg0, %c0_i32 : i32, i32
  }
}

</mosaic_0001>

<bundles_post_ra>
// kernel: nn_model_forward.1
= control target key start
LH: loop header
LB: loop body
LE: loop exit
PB: predicated region body
PF: predicated region fallthrough
CT: control target
= control target key end

     0   :  { %v1104_v3 = vmov 0.0   ;;  %vm87_vm0 = vcmask 195584   ;;  %vm808_vm1 = vcmask 64512   ;;  %s1637_s1 = inlined_call_operand.vmem [shape: f32[24,1024], index: 1, kind: input, shape index: {}]   ;;  %s1638_s0 = inlined_call_operand.vmem [shape: f32[8,24], index: 0, kind: input, shape index: {}]   ;;  %s1639_s3 = inlined_call_operand.vmem [shape: f32[1024,8], index: 3, kind: input, shape index: {}]   ;;  %s1640_s2 = inlined_call_operand.vmem [shape: f32[1,1024], index: 2, kind: input, shape index: {}]   ;;  %s1641_s4 = inlined_call_operand.vmem [shape: f32[1,8], index: 4, kind: input, shape index: {}]   ;;  %s1642_s5 = inlined_call_operand.vmem [shape: f32[8,8], index: 5, kind: output, shape index: {}]  }
   0x1   :  { %v22_v0 = vld [vmem:[%s1637_s1 + $0x8] sm:$0xff]  ;;  %v24_v2 = vld [vmem:[%s1637_s1 + $0x18] sm:$0xff]  ;;  %155 = vmatprep.mubr.f32.mxu0 %v1104_v3  ;;  %226 = vmatprep.mubr.f32.mxu1 %v1104_v3  ;;  %v21_v6 = vld [vmem:[%s1637_s1] sm:$0xff] }
   0x2   :  { %v30_v1 = vld [vmem:[%s1637_s1 + $0x48] sm:$0xff]  ;;  %v32_v5 = vld [vmem:[%s1637_s1 + $0x58] sm:$0xff]  ;;  %v29_v7 = vld [vmem:[%s1637_s1 + $0x40] sm:$0xff] }
   0x3   :  { %v959_v4 = vpack.c.bf16 %v30_v1, %v22_v0  ;;  %v963_v8 = vpack.c.bf16 %v32_v5, %v24_v2  ;;  %v961_v9 = vpack.c.bf16 %v29_v7, %v21_v6  ;;  %v23_v10 = vld [vmem:[%s1637_s1 + $0x10] sm:$0xff]  ;;  %v38_v12 = vld [vmem:[%s1637_s1 + $0x88] sm:$0xff]  ;;  %v40_v14 = vld [vmem:[%s1637_s1 + $0x98] sm:$0xff] }
   0x4   :  { %v31_v11 = vld [vmem:[%s1637_s1 + $0x50] sm:$0xff]  ;;  %v37_v15 = vld [vmem:[%s1637_s1 + $0x80] sm:$0xff]  ;;  %v26_v18 = vld [vmem:[%s1637_s1 + $0x28] sm:$0xff] }
   0x5   :  { %960 = vmatprep.subr.bf16.mxu0 %v959_v4  ;;  %v965_v13 = vpack.c.bf16 %v31_v11, %v23_v10  ;;  %964 = vmatprep.subr.bf16.mxu1 %v963_v8  ;;  %v39_v16 = vld [vmem:[%s1637_s1 + $0x90] sm:$0xff]  ;;  %v20_v17 = vld [vmem:[%s1638_s0] sm:$0xff]  ;;  %v34_v19 = vld [vmem:[%s1637_s1 + $0x68] sm:$0xff] }
   0x6   :  { %962 = vmatpush1.bf16.msra.mxu0 %v961_v9  ;;  %v25_v20 = vld [vmem:[%s1637_s1 + $0x20] sm:$0xff]  ;;  %v28_v22 = vld [vmem:[%s1637_s1 + $0x38] sm:$0xff]  ;;  %v967_v23 = vpack.c.bf16 %v34_v19, %v26_v18  ;;  %v27_v25 = vld [vmem:[%s1637_s1 + $0x30] sm:$0xff] }
   0x7   :  { %966 = vmatpush1.bf16.msra.mxu1 %v965_v13  ;;  %95 = vmatprep.subr.mxu0 %v38_v12  ;;  %v33_v21 = vld [vmem:[%s1637_s1 + $0x60] sm:$0xff]  ;;  %v36_v24 = vld [vmem:[%s1637_s1 + $0x78] sm:$0xff]  ;;  %v35_v26 = vld [vmem:[%s1637_s1 + $0x70] sm:$0xff] }
   0x8   :  { %166 = vmatprep.subr.mxu1 %v40_v14  ;;  %v969_v27 = vpack.c.bf16 %v33_v21, %v25_v20  ;;  %v971_v28 = vpack.c.bf16 %v36_v24, %v28_v22  ;;  %v973_v29 = vpack.c.bf16 %v35_v26, %v27_v25  ;;  %v42_v30 = vld [vmem:[%s1637_s1 + $0xa8] sm:$0xff]  ;;  %v44_v31 = vld [vmem:[%s1637_s1 + $0xb8] sm:$0xff]  ;;  %v407_v32 = vld [vmem:[%s1639_s3 + $0x80] sm:$0xff] }
   0x9   :  { %v41_v33 = vld [vmem:[%s1637_s1 + $0xa0] sm:$0xff]  ;;  %v408_v34 = vld [vmem:[%s1639_s3 + $0x88] sm:$0xff]  ;;  %v409_v41 = vld [vmem:[%s1639_s3 + $0x90] sm:$0xff] }
   0xa   :  { %96 = vmatpush1.msra.mxu0 %v37_v15  ;;  %v439_v35 = vld [vmem:[%s1639_s3 + $0x180] sm:$0xff]  ;;  %v440_v36 = vld [vmem:[%s1639_s3 + $0x188] sm:$0xff]  ;;  %v410_v42 = vld [vmem:[%s1639_s3 + $0x98] sm:$0xff]  ;;  %v975_v44 = vpack.c.bf16 %v408_v34, %v407_v32 }
   0xb   :  { %167 = vmatpush1.msra.mxu1 %v39_v16  ;;  %814 = vmatmul.mubr.msk.f32.vlgmr.msra.gmra.mrb[0].mxu0 %vm87_vm0, %v20_v17  ;;  %v391_v37 = vld [vmem:[%s1639_s3] sm:$0xff]  ;;  %v392_v38 = vld [vmem:[%s1639_s3 + $0x8] sm:$0xff]  ;;  %v43_v43 = vld [vmem:[%s1637_s1 + $0xb0] sm:$0xff]  ;;  %v1007_v47 = vpack.c.bf16 %v440_v36, %v439_v35  ;;  %v979_v50 = vpack.c.bf16 %v410_v42, %v409_v41 }
   0xc   :  { %815 = vmatmul.mubr.msk.f32.vlgmr.msra.gmra.mrb[0].mxu1 %vm87_vm0, %v20_v17  ;;  %968 = vmatprep.subr.bf16.mxu0 %v967_v23  ;;  %v423_v39 = vld [vmem:[%s1639_s3 + $0x100] sm:$0xff]  ;;  %v424_v40 = vld [vmem:[%s1639_s3 + $0x108] sm:$0xff]  ;;  %v441_v45 = vld [vmem:[%s1639_s3 + $0x190] sm:$0xff]  ;;  %v977_v48 = vpack.c.bf16 %v392_v38, %v391_v37 }
   0xd   :  { %970 = vmatpush1.bf16.msra.mxu0 %v969_v27  ;;  %972 = vmatprep.subr.bf16.mxu1 %v971_v28  ;;  %v442_v46 = vld [vmem:[%s1639_s3 + $0x198] sm:$0xff]  ;;  %v1009_v49 = vpack.c.bf16 %v424_v40, %v423_v39  ;;  %v393_v51 = vld [vmem:[%s1639_s3 + $0x10] sm:$0xff]  ;;  %v411_v56 = vld [vmem:[%s1639_s3 + $0xa0] sm:$0xff] }
   0xe   :  { %974 = vmatpush1.bf16.msra.mxu1 %v973_v29  ;;  %237 = vmatprep.subr.mxu0 %v42_v30  ;;  %v394_v52 = vld [vmem:[%s1639_s3 + $0x18] sm:$0xff]  ;;  %v425_v53 = vld [vmem:[%s1639_s3 + $0x110] sm:$0xff]  ;;  %v1011_v54 = vpack.c.bf16 %v442_v46, %v441_v45  ;;  %v412_v57 = vld [vmem:[%s1639_s3 + $0xa8] sm:$0xff] }
   0xf   :  { %297 = vmatprep.mubr.f32.mxu0 %v1104_v3  ;;  %308 = vmatprep.subr.mxu1 %v44_v31  ;;  %v426_v55 = vld [vmem:[%s1639_s3 + $0x118] sm:$0xff]  ;;  %v443_v58 = vld [vmem:[%s1639_s3 + $0x1a0] sm:$0xff]  ;;  %v444_v59 = vld [vmem:[%s1639_s3 + $0x1a8] sm:$0xff]  ;;  %v981_v60 = vpack.c.bf16 %v394_v52, %v393_v51  ;;  %v983_v62 = vpack.c.bf16 %v412_v57, %v411_v56 }
  0x10   :  { %368 = vmatprep.mubr.f32.mxu1 %v1104_v3  ;;  %v1013_v61 = vpack.c.bf16 %v426_v55, %v425_v53  ;;  %v395_v63 = vld [vmem:[%s1639_s3 + $0x20] sm:$0xff]  ;;  %v396_v0 = vld [vmem:[%s1639_s3 + $0x28] sm:$0xff]  ;;  %v1015_v2 = vpack.c.bf16 %v444_v59, %v443_v58  ;;  %v413_v4 = vld [vmem:[%s1639_s3 + $0xb0] sm:$0xff] }
  0x11   :  { %238 = vmatpush1.msra.mxu0 %v41_v33  ;;  %v427_v1 = vld [vmem:[%s1639_s3 + $0x120] sm:$0xff]  ;;  %v428_v3 = vld [vmem:[%s1639_s3 + $0x128] sm:$0xff]  ;;  %v414_v5 = vld [vmem:[%s1639_s3 + $0xb8] sm:$0xff]  ;;  %v985_v8 = vpack.c.bf16 %v396_v0, %v395_v63 }
  0x12   :  { %816 = vmatmul.mubr.msk.f32.vlgmr.msra.gmra.mrb[2].mxu0 %vm87_vm0, %v20_v17  ;;  %309 = vmatpush1.msra.mxu1 %v43_v43  ;;  %v445_v6 = vld [vmem:[%s1639_s3 + $0x1b0] sm:$0xff]  ;;  %v446_v7 = vld [vmem:[%s1639_s3 + $0x1b8] sm:$0xff]  ;;  %v1017_v9 = vpack.c.bf16 %v428_v3, %v427_v1  ;;  %v987_v10 = vpack.c.bf16 %v414_v5, %v413_v4  ;;  %v415_v16 = vld [vmem:[%s1639_s3 + $0xc0] sm:$0xff] }
  0x13   :  { %817 = vmatmul.mubr.msk.f32.vlgmr.msra.gmra.mrb[2].mxu1 %vm87_vm0, %v20_v17  ;;  %976 = vmatprep.subr.bf16.mxu0 %v975_v44  ;;  %v397_v11 = vld [vmem:[%s1639_s3 + $0x30] sm:$0xff]  ;;  %v398_v12 = vld [vmem:[%s1639_s3 + $0x38] sm:$0xff]  ;;  %v1019_v14 = vpack.c.bf16 %v446_v7, %v445_v6  ;;  %v416_v17 = vld [vmem:[%s1639_s3 + $0xc8] sm:$0xff] }
  0x14   :  { %1008 = vmatprep.subr.bf16.mxu1 %v1007_v47  ;;  %978 = vmatpush3.bf16.msra.mxu0 %v977_v48  ;;  %v429_v13 = vld [vmem:[%s1639_s3 + $0x130] sm:$0xff]  ;;  %v430_v15 = vld [vmem:[%s1639_s3 + $0x138] sm:$0xff]  ;;  %v447_v18 = vld [vmem:[%s1639_s3 + $0x1c0] sm:$0xff]  ;;  %v989_v20 = vpack.c.bf16 %v398_v12, %v397_v11  ;;  %v991_v22 = vpack.c.bf16 %v416_v17, %v415_v16 }
  0x15   :  { %1010 = vmatpush3.bf16.msra.mxu1 %v1009_v49  ;;  %980 = vmatprep.subr.bf16.mxu0 %v979_v50  ;;  %v448_v19 = vld [vmem:[%s1639_s3 + $0x1c8] sm:$0xff]  ;;  %v1021_v21 = vpack.c.bf16 %v430_v15, %v429_v13  ;;  %v399_v23 = vld [vmem:[%s1639_s3 + $0x40] sm:$0xff]  ;;  %v417_v28 = vld [vmem:[%s1639_s3 + $0xd0] sm:$0xff] }
  0x16   :  { %1012 = vmatprep.subr.bf16.mxu1 %v1011_v54  ;;  %v400_v24 = vld [vmem:[%s1639_s3 + $0x48] sm:$0xff]  ;;  %v431_v25 = vld [vmem:[%s1639_s3 + $0x140] sm:$0xff]  ;;  %v1023_v26 = vpack.c.bf16 %v448_v19, %v447_v18  ;;  %v418_v29 = vld [vmem:[%s1639_s3 + $0xd8] sm:$0xff] }
  0x17   :  { %v432_v27 = vld [vmem:[%s1639_s3 + $0x148] sm:$0xff]  ;;  %v449_v30 = vld [vmem:[%s1639_s3 + $0x1d0] sm:$0xff]  ;;  %v450_v31 = vld [vmem:[%s1639_s3 + $0x1d8] sm:$0xff]  ;;  %v993_v32 = vpack.c.bf16 %v400_v24, %v399_v23  ;;  %v995_v34 = vpack.c.bf16 %v418_v29, %v417_v28 }
  0x18   :  { %982 = vmatpush3.bf16.msra.mxu0 %v981_v60  ;;  %v1025_v33 = vpack.c.bf16 %v432_v27, %v431_v25  ;;  %v401_v35 = vld [vmem:[%s1639_s3 + $0x50] sm:$0xff]  ;;  %v402_v36 = vld [vmem:[%s1639_s3 + $0x58] sm:$0xff]  ;;  %v1027_v37 = vpack.c.bf16 %v450_v31, %v449_v30  ;;  %v419_v42 = vld [vmem:[%s1639_s3 + $0xe0] sm:$0xff] }
  0x19   :  { %1014 = vmatpush3.bf16.msra.mxu1 %v1013_v61  ;;  %984 = vmatprep.subr.bf16.mxu0 %v983_v62  ;;  %v433_v38 = vld [vmem:[%s1639_s3 + $0x150] sm:$0xff]  ;;  %v434_v39 = vld [vmem:[%s1639_s3 + $0x158] sm:$0xff]  ;;  %v997_v40 = vpack.c.bf16 %v402_v36, %v401_v35  ;;  %v420_v43 = vld [vmem:[%s1639_s3 + $0xe8] sm:$0xff] }
  0x1a   :  { %1016 = vmatprep.subr.bf16.mxu1 %v1015_v2  ;;  %v1029_v41 = vpack.c.bf16 %v434_v39, %v433_v38  ;;  %v451_v44 = vld [vmem:[%s1639_s3 + $0x1e0] sm:$0xff]  ;;  %v999_v45 = vpack.c.bf16 %v420_v43, %v419_v42  ;;  %v452_v46 = vld [vmem:[%s1639_s3 + $0x1e8] sm:$0xff]  ;;  %v421_v54 = vld [vmem:[%s1639_s3 + $0xf0] sm:$0xff] }
  0x1b   :  { %v403_v47 = vld [vmem:[%s1639_s3 + $0x60] sm:$0xff]  ;;  %v404_v48 = vld [vmem:[%s1639_s3 + $0x68] sm:$0xff]  ;;  %v1031_v49 = vpack.c.bf16 %v452_v46, %v451_v44  ;;  %v422_v55 = vld [vmem:[%s1639_s3 + $0xf8] sm:$0xff] }
  0x1c   :  { %986 = vmatpush3.bf16.msra.mxu0 %v985_v8  ;;  %v1001_v50 = vpack.c.bf16 %v404_v48, %v403_v47  ;;  %v435_v51 = vld [vmem:[%s1639_s3 + $0x160] sm:$0xff]  ;;  %v436_v52 = vld [vmem:[%s1639_s3 + $0x168] sm:$0xff]  ;;  %v453_v56 = vld [vmem:[%s1639_s3 + $0x1f0] sm:$0xff]  ;;  %v1003_v57 = vpack.c.bf16 %v422_v55, %v421_v54  ;;  %v47_v8 = vlaneseq }
  0x1d   :  { %1018 = vmatpush3.bf16.msra.mxu1 %v1017_v9  ;;  %988 = vmatprep.subr.bf16.mxu0 %v987_v10  ;;  %v1033_v53 = vpack.c.bf16 %v436_v52, %v435_v51  ;;  %v454_v58 = vld [vmem:[%s1639_s3 + $0x1f8] sm:$0xff]  ;;  %v405_v59 = vld [vmem:[%s1639_s3 + $0x70] sm:$0xff]  ;;  %v471_v2 = vld [vmem:[%s1639_s3 + $0x280] sm:$0xff] }
  0x1e   :  { %1020 = vmatprep.subr.bf16.mxu1 %v1019_v14  ;;  %v406_v60 = vld [vmem:[%s1639_s3 + $0x78] sm:$0xff]  ;;  %v1035_v61 = vpack.c.bf16 %v454_v58, %v453_v56  ;;  %v437_v63 = vld [vmem:[%s1639_s3 + $0x170] sm:$0xff]  ;;  %v472_v3 = vld [vmem:[%s1639_s3 + $0x288] sm:$0xff]  ;;  %v1422_v9 = vshrl.u32 %v47_v8, 7 }
  0x1f   :  { %v1005_v62 = vpack.c.bf16 %v406_v60, %v405_v59  ;;  %v438_v0 = vld [vmem:[%s1639_s3 + $0x178] sm:$0xff]  ;;  %v503_v4 = vld [vmem:[%s1639_s3 + $0x380] sm:$0xff]  ;;  %v1039_v5 = vpack.c.bf16 %v472_v3, %v471_v2  ;;  %v504_v6 = vld [vmem:[%s1639_s3 + $0x388] sm:$0xff] }
  0x20   :  { %990 = vmatpush3.bf16.msra.mxu0 %v989_v20  ;;  %v1037_v1 = vpack.c.bf16 %v438_v0, %v437_v63  ;;  %v1071_v7 = vpack.c.bf16 %v504_v6, %v503_v4  ;;  %v49_v10 = vsub.s32 0, %v1422_v9  ;;  %v1428_v11 = vld [vmem:[%s1640_s2] sm:$0xff]  ;;  %v57_v12 = vsub.s32 2, %v1422_v9  ;;  %v456_v31 = vld [vmem:[%s1639_s3 + $0x208] sm:$0xff]  ;;  %v473_v36 = vld [vmem:[%s1639_s3 + $0x290] sm:$0xff] }
  0x21   :  { %1022 = vmatpush3.bf16.msra.mxu1 %v1021_v21  ;;  %992 = vmatprep.subr.bf16.mxu0 %v991_v22  ;;  %v53_v13 = vsub.s32 1, %v1422_v9  ;;  %v61_v14 = vsub.s32 3, %v1422_v9  ;;  %v69_v23 = vsub.s32 5, %v1422_v9  ;;  %v455_v27 = vld [vmem:[%s1639_s3 + $0x200] sm:$0xff]  ;;  %v77_v28 = vsub.s32 7, %v1422_v9  ;;  %v505_v39 = vld [vmem:[%s1639_s3 + $0x390] sm:$0xff] }
  0x22   :  { %1024 = vmatprep.subr.bf16.mxu1 %v1023_v26  ;;  %v50_v15 = vrot.slane %v1428_v11, %v49_v10  ;;  %v58_v16 = vrot.slane %v1428_v11, %v57_v12  ;;  %v1041_v43 = vpack.c.bf16 %v456_v31, %v455_v27  ;;  %v489_v51 = vld [vmem:[%s1639_s3 + $0x310] sm:$0xff]  ;;  %v490_v55 = vld [vmem:[%s1639_s3 + $0x318] sm:$0xff]  ;;  %v475_v56 = vld [vmem:[%s1639_s3 + $0x2a0] sm:$0xff] }
  0x23   :  { %v54_v17 = vrot.slane %v1428_v11, %v53_v13  ;;  %v62_v18 = vrot.slane %v1428_v11, %v61_v14  ;;  %v78_v44 = vrot.slane %v1428_v11, %v77_v28  ;;  %v507_v60 = vld [vmem:[%s1639_s3 + $0x3a0] sm:$0xff]  ;;  %v1077_v2 = vpack.c.bf16 %v490_v55, %v489_v51  ;;  %v492_v10 = vld [vmem:[%s1639_s3 + $0x328] sm:$0xff]  ;;  %v477_v12 = vld [vmem:[%s1639_s3 + $0x2b0] sm:$0xff] }
  0x24   :  { %994 = vmatpush3.bf16.msra.mxu0 %v993_v32  ;;  %v487_v32 = vld [vmem:[%s1639_s3 + $0x300] sm:$0xff]  ;;  %v478_v13 = vld [vmem:[%s1639_s3 + $0x2b8] sm:$0xff]  ;;  %v480_v28 = vld [vmem:[%s1639_s3 + $0x2c8] sm:$0xff] }
  0x25   :  { %1026 = vmatpush3.bf16.msra.mxu1 %v1025_v33  ;;  %996 = vmatprep.subr.bf16.mxu0 %v995_v34  ;;  %v488_v33 = vld [vmem:[%s1639_s3 + $0x308] sm:$0xff]  ;;  %v459_v4 = vld [vmem:[%s1639_s3 + $0x220] sm:$0xff]  ;;  %v498_v51 = vld [vmem:[%s1639_s3 + $0x358] sm:$0xff] }
  0x26   :  { %1028 = vmatprep.subr.bf16.mxu1 %v1027_v37  ;;  %v474_v37 = vld [vmem:[%s1639_s3 + $0x298] sm:$0xff]  ;;  %v1073_v47 = vpack.c.bf16 %v488_v33, %v487_v32  ;;  %v491_v6 = vld [vmem:[%s1639_s3 + $0x320] sm:$0xff]  ;;  %v484_v55 = vld [vmem:[%s1639_s3 + $0x2e8] sm:$0xff] }
  0x27   :  { %v1043_v48 = vpack.c.bf16 %v474_v37, %v473_v36  ;;  %v479_v27 = vld [vmem:[%s1639_s3 + $0x2c0] sm:$0xff] }
  0x28   :  { %998 = vmatpush3.bf16.msra.mxu0 %v997_v40  ;;  %v506_v40 = vld [vmem:[%s1639_s3 + $0x398] sm:$0xff]  ;;  %v1055_v33 = vpack.c.bf16 %v480_v28, %v479_v27  ;;  %v495_v36 = vld [vmem:[%s1639_s3 + $0x340] sm:$0xff] }
  0x29   :  { %1030 = vmatpush3.bf16.msra.mxu1 %v1029_v41  ;;  %1000 = vmatprep.subr.bf16.mxu0 %v999_v45  ;;  %v70_v41 = vrot.slane %v1428_v11, %v69_v23  ;;  %v1075_v54 = vpack.c.bf16 %v506_v40, %v505_v39  ;;  %v462_v23 = vld [vmem:[%s1639_s3 + $0x238] sm:$0xff]  ;;  %v481_v39 = vld [vmem:[%s1639_s3 + $0x2d0] sm:$0xff] }
  0x2a   :  { %1032 = vmatprep.subr.bf16.mxu1 %v1031_v49  ;;  %v457_v49 = vld [vmem:[%s1639_s3 + $0x210] sm:$0xff]  ;;  %v482_v40 = vld [vmem:[%s1639_s3 + $0x2d8] sm:$0xff] }
  0x2c   :  { %1002 = vmatpush3.bf16.msra.mxu0 %v1001_v50  ;;  %v458_v50 = vld [vmem:[%s1639_s3 + $0x218] sm:$0xff] }
  0x2d   :  { %1034 = vmatpush3.bf16.msra.mxu1 %v1033_v53  ;;  %1004 = vmatprep.subr.bf16.mxu0 %v1003_v57  ;;  %v476_v57 = vld [vmem:[%s1639_s3 + $0x2a8] sm:$0xff]  ;;  %v1045_v0 = vpack.c.bf16 %v458_v50, %v457_v49  ;;  %v497_v49 = vld [vmem:[%s1639_s3 + $0x350] sm:$0xff] }
  0x2e   :  { %1036 = vmatprep.subr.bf16.mxu1 %v1035_v61  ;;  %v508_v61 = vld [vmem:[%s1639_s3 + $0x3a8] sm:$0xff]  ;;  %v1047_v3 = vpack.c.bf16 %v476_v57, %v475_v56  ;;  %v515_v56 = vld [vmem:[%s1639_s3 + $0x3e0] sm:$0xff] }
  0x2f   :  { %v1079_v8 = vpack.c.bf16 %v508_v61, %v507_v60  ;;  %v516_v57 = vld [vmem:[%s1639_s3 + $0x3e8] sm:$0xff]  ;;  %v1093_v60 = vpack.c.bf16 %v498_v51, %v497_v49 }
  0x30   :  { %1006 = vmatpush3.bf16.msra.mxu0 %v1005_v62 }
  0x31   :  { %1038 = vmatpush3.bf16.msra.mxu1 %v1037_v1  ;;  %1040 = vmatprep.subr.bf16.mxu0 %v1039_v5  ;;  %v460_v5 = vld [vmem:[%s1639_s3 + $0x228] sm:$0xff] }
  0x32   :  { %1072 = vmatprep.subr.bf16.mxu1 %v1071_v7 }
  0xde   :  { %v157_v19 = vpop.f32.mrb[0].mxu0 }
  0xdf   :  { %v158_v20 = vadd.f32 %v157_v19, %v50_v15  ;;  %v228_v21 = vpop.f32.mrb[0].mxu1  ;;  %v159_v22 = vpop.f32.mrb[1].mxu0  ;;  %v509_v15 = vld [vmem:[%s1639_s3 + $0x3b0] sm:$0xff] }
  0xe0   :  { %v229_v24 = vadd.f32 %v228_v21, %v58_v16  ;;  %v160_v25 = vadd.f32 %v159_v22, %v54_v17  ;;  %v230_v26 = vpop.f32.mrb[1].mxu1  ;;  %v510_v16 = vld [vmem:[%s1639_s3 + $0x3b8] sm:$0xff]  ;;  %v1051_v21 = vpack.c.bf16 %v478_v13, %v477_v12  ;;  %v461_v22 = vld [vmem:[%s1639_s3 + $0x230] sm:$0xff] }
  0xe1   :  { %v375_v29 = vmul.f32 0.3, %v158_v20  ;;  %v231_v30 = vadd.f32 %v230_v26, %v62_v18  ;;  %v1049_v18 = vpack.c.bf16 %v460_v5, %v459_v4  ;;  %v494_v26 = vld [vmem:[%s1639_s3 + $0x338] sm:$0xff]  ;;  %v1053_v31 = vpack.c.bf16 %v462_v23, %v461_v22  ;;  %v485_v4 = vld [vmem:[%s1639_s3 + $0x2f0] sm:$0xff] }
  0xe2   :  { %v377_v34 = vmul.f32 0.3, %v229_v24  ;;  %v376_v35 = vmul.f32 0.3, %v160_v25  ;;  %v486_v5 = vld [vmem:[%s1639_s3 + $0x2f8] sm:$0xff]  ;;  %v469_v13 = vld [vmem:[%s1639_s3 + $0x270] sm:$0xff] }
  0xe3   :  { %v378_v38 = vmul.f32 0.3, %v231_v30  ;;  %v383_v45 = vmax.f32 %v158_v20, %v375_v29  ;;  %v1081_v20 = vpack.c.bf16 %v492_v10, %v491_v6  ;;  %v511_v29 = vld [vmem:[%s1639_s3 + $0x3c0] sm:$0xff]  ;;  %v517_v6 = vld [vmem:[%s1639_s3 + $0x3f0] sm:$0xff]  ;;  %v1067_v12 = vpack.c.bf16 %v486_v5, %v485_v4 }
  0xe4   :  { %v384_v42 = vmax.f32 %v160_v25, %v376_v35  ;;  %v385_v53 = vmax.f32 %v229_v24, %v377_v34  ;;  %v493_v24 = vld [vmem:[%s1639_s3 + $0x330] sm:$0xff]  ;;  %v1083_v25 = vpack.c.bf16 %v510_v16, %v509_v15  ;;  %v463_v34 = vld [vmem:[%s1639_s3 + $0x240] sm:$0xff]  ;;  %v464_v35 = vld [vmem:[%s1639_s3 + $0x248] sm:$0xff] }
  0xe5   :  { %v386_v46 = vmax.f32 %v231_v30, %v378_v38  ;;  %v1474_v52 = vpop.f32.mrb[2].mxu0  ;;  %v512_v30 = vld [vmem:[%s1639_s3 + $0x3c8] sm:$0xff]  ;;  %v1085_v32 = vpack.c.bf16 %v494_v26, %v493_v24 }
  0xe6   :  { %590 = vmatprep.mubr.f32.mxu0 %v384_v42  ;;  %v301_v58 = vpop.f32.mrb[3].mxu0  ;;  %v1485_v59 = vpop.f32.mrb[2].mxu1  ;;  %v1087_v37 = vpack.c.bf16 %v512_v30, %v511_v29  ;;  %v496_v38 = vld [vmem:[%s1639_s3 + $0x348] sm:$0xff]  ;;  %v514_v42 = vld [vmem:[%s1639_s3 + $0x3d8] sm:$0xff] }
  0xe7   :  { %660 = vmatprep.mubr.f32.mxu1 %v386_v46  ;;  %591 = vmatmul.mubr.f32.vlgmr.msra.gmra.mrb[4].mxu0 %v383_v45  ;;  %v302_v62 = vadd.f32 %v301_v58, %v70_v41  ;;  %v372_v63 = vpop.f32.mrb[3].mxu1  ;;  %v513_v41 = vld [vmem:[%s1639_s3 + $0x3d0] sm:$0xff]  ;;  %v65_v45 = vsub.s32 4, %v1422_v9  ;;  %v1059_v46 = vpack.c.bf16 %v482_v40, %v481_v39 }
  0xe8   :  { %661 = vmatmul.mubr.f32.vlgmr.msra.gmra.mrb[4].mxu1 %v385_v53  ;;  %1042 = vmatpush3.bf16.msra.mxu0 %v1041_v43  ;;  %v373_v1 = vadd.f32 %v372_v63, %v78_v44  ;;  %v1057_v43 = vpack.c.bf16 %v464_v35, %v463_v34  ;;  %v1089_v44 = vpack.c.bf16 %v496_v38, %v495_v36  ;;  %v73_v53 = vsub.s32 6, %v1422_v9  ;;  %v468_v63 = vld [vmem:[%s1639_s3 + $0x268] sm:$0xff] }
  0xe9   :  { %1074 = vmatpush3.bf16.msra.mxu1 %v1073_v47  ;;  %1044 = vmatprep.subr.bf16.mxu0 %v1043_v48  ;;  %v380_v7 = vmul.f32 0.3, %v302_v62  ;;  %v465_v47 = vld [vmem:[%s1639_s3 + $0x250] sm:$0xff]  ;;  %v466_v48 = vld [vmem:[%s1639_s3 + $0x258] sm:$0xff]  ;;  %v1091_v50 = vpack.c.bf16 %v514_v42, %v513_v41  ;;  %v66_v9 = vrot.slane %v1428_v11, %v65_v45 }
  0xea   :  { %1076 = vmatprep.subr.bf16.mxu1 %v1075_v54  ;;  %v382_v14 = vmul.f32 0.3, %v373_v1  ;;  %v483_v54 = vld [vmem:[%s1639_s3 + $0x2e0] sm:$0xff]  ;;  %v1061_v58 = vpack.c.bf16 %v466_v48, %v465_v47 }
  0xeb   :  { %v388_v17 = vmax.f32 %v302_v62, %v380_v7  ;;  %v1063_v61 = vpack.c.bf16 %v484_v55, %v483_v54  ;;  %v467_v62 = vld [vmem:[%s1639_s3 + $0x260] sm:$0xff] }
  0xec   :  { %1046 = vmatpush3.bf16.msra.mxu0 %v1045_v0  ;;  %v390_v19 = vmax.f32 %v373_v1, %v382_v14  ;;  %v499_v0 = vld [vmem:[%s1639_s3 + $0x360] sm:$0xff]  ;;  %v74_v1 = vrot.slane %v1428_v11, %v73_v53  ;;  %v518_v11 = vld [vmem:[%s1639_s3 + $0x3f8] sm:$0xff]  ;;  %v1065_v7 = vpack.c.bf16 %v468_v63, %v467_v62 }
  0xed   :  { %1078 = vmatpush3.bf16.msra.mxu1 %v1077_v2  ;;  %1048 = vmatprep.subr.bf16.mxu0 %v1047_v3  ;;  %v1095_v2 = vpack.c.bf16 %v516_v57, %v515_v56  ;;  %v500_v3 = vld [vmem:[%s1639_s3 + $0x368] sm:$0xff]  ;;  %v470_v14 = vld [vmem:[%s1639_s3 + $0x278] sm:$0xff]  ;;  %v1099_v16 = vpack.c.bf16 %v518_v11, %v517_v6 }
  0xee   :  { %1080 = vmatprep.subr.bf16.mxu1 %v1079_v8  ;;  %730 = vmatprep.mubr.f32.mxu0 %v388_v17  ;;  %v300_v8 = vadd.f32 %v1474_v52, %v66_v9  ;;  %v1097_v10 = vpack.c.bf16 %v500_v3, %v499_v0  ;;  %v371_v15 = vadd.f32 %v1485_v59, %v74_v1  ;;  %v501_v52 = vld [vmem:[%s1639_s3 + $0x370] sm:$0xff]  ;;  %v502_v17 = vld [vmem:[%s1639_s3 + $0x378] sm:$0xff] }
  0xef   :  { %800 = vmatprep.mubr.f32.mxu1 %v390_v19 }
  0xf0   :  { %1050 = vmatpush3.bf16.msra.mxu0 %v1049_v18  ;;  %v1069_v18 = vpack.c.bf16 %v470_v14, %v469_v13  ;;  %v379_v19 = vmul.f32 0.3, %v300_v8 }
  0xf1   :  { %1082 = vmatpush3.bf16.msra.mxu1 %v1081_v20  ;;  %1052 = vmatprep.subr.bf16.mxu0 %v1051_v21  ;;  %v1101_v20 = vpack.c.bf16 %v502_v17, %v501_v52  ;;  %v381_v21 = vmul.f32 0.3, %v371_v15 }
  0xf2   :  { %1084 = vmatprep.subr.bf16.mxu1 %v1083_v25  ;;  %v387_v59 = vmax.f32 %v300_v8, %v379_v19  ;;  %v818_v25 = vld [vmem:[%s1641_s4] ss:$0 sm:$0xff] }
  0xf3   :  { %v389_v22 = vmax.f32 %v371_v15, %v381_v21 }
  0xf4   :  { %1054 = vmatpush3.bf16.msra.mxu0 %v1053_v31 }
  0xf5   :  { %1086 = vmatpush3.bf16.msra.mxu1 %v1085_v32  ;;  %1056 = vmatprep.subr.bf16.mxu0 %v1055_v33 }
  0xf6   :  { %1088 = vmatprep.subr.bf16.mxu1 %v1087_v37 }
  0xf8   :  { %1058 = vmatpush3.bf16.msra.mxu0 %v1057_v43 }
  0xf9   :  { %1090 = vmatpush3.bf16.msra.mxu1 %v1089_v44  ;;  %1060 = vmatprep.subr.bf16.mxu0 %v1059_v46 }
  0xfa   :  { %1092 = vmatprep.subr.bf16.mxu1 %v1091_v50 }
  0xfc   :  { %1062 = vmatpush3.bf16.msra.mxu0 %v1061_v58 }
  0xfd   :  { %1094 = vmatpush3.bf16.msra.mxu1 %v1093_v60  ;;  %1064 = vmatprep.subr.bf16.mxu0 %v1063_v61 }
  0xfe   :  { %1096 = vmatprep.subr.bf16.mxu1 %v1095_v2 }
 0x100   :  { %1066 = vmatpush3.bf16.msra.mxu0 %v1065_v7 }
 0x101   :  { %1098 = vmatpush3.bf16.msra.mxu1 %v1097_v10  ;;  %1068 = vmatprep.subr.bf16.mxu0 %v1067_v12 }
 0x102   :  { %1100 = vmatprep.subr.bf16.mxu1 %v1099_v16 }
 0x104   :  { %1070 = vmatpush3.bf16.msra.mxu0 %v1069_v18 }
 0x105   :  { %1102 = vmatpush3.bf16.msra.mxu1 %v1101_v20 }
 0x107   :  { %731 = vmatmul.mubr.f32.vlgmr.msra.gmra.mrb[6].mxu0 %v387_v59 }
 0x108   :  { %801 = vmatmul.mubr.f32.vlgmr.msra.gmra.mrb[6].mxu1 %v389_v22 }
 0x1ba   :  { %v851_v23 = vpop.f32.mrb[4].mxu0 }
 0x1bb   :  { %v886_v24 = vpop.f32.mrb[4].mxu1  ;;  %v852_v26 = vpop.f32.mrb[5].mxu0 }
 0x1bc   :  { %v853_v27 = vadd.f32 %v852_v26, %v851_v23  ;;  %v887_v28 = vpop.f32.mrb[5].mxu1 }
 0x1bd   :  { %v888_v29 = vadd.f32 %v887_v28, %v886_v24 }
 0x1be   :  { %v593_v30 = vadd.f32 %v853_v27, %v818_v25 }
 0x1c0   :  { %v663_v31 = vadd.f32 %v888_v29, %v593_v30 }
 0x1da   :  { %v921_v32 = vpop.f32.mrb[6].mxu0 }
 0x1db   :  { %v956_v33 = vpop.f32.mrb[6].mxu1  ;;  %v922_v34 = vpop.f32.mrb[7].mxu0 }
 0x1dc   :  { %v923_v35 = vadd.f32 %v922_v34, %v921_v32  ;;  %v957_v36 = vpop.f32.mrb[7].mxu1 }
 0x1dd   :  { %v958_v37 = vadd.f32 %v957_v36, %v956_v33 }
 0x1de   :  { %v733_v38 = vadd.f32 %v923_v35, %v663_v31 }
 0x1e0   :  { %v803_v39 = vadd.f32 %v958_v37, %v733_v38 }
 0x1e2   :  { %v806_v40 = vmul.f32 0.3, %v803_v39 }
 0x1e4   :  { %v807_v41 = vmax.f32 %v803_v39, %v806_v40 }
 0x1e6   :  { %809 = vst.msk [vmem:[%s1642_s5] sm:$0xff] %vm808_vm1, %v807_v41 }

</bundles_post_ra>
